<compile_context>
chip_gen: v7x
topology: tpu7x:2x2x1
jax: 0.10.0
libtpu: 0.0.40
codegen_flags: <defaults>
</compile_context>

<pallas_src>
import jax
import jax.numpy as jnp
from jax.experimental import pallas as pl
from jax.experimental.pallas import tpu as pltpu


def _copy_kernel(feat_ref, mask_ref, feat_out_ref, mask_out_ref):
    # (rows, LANE) lane-dense tiles; pure vreg-width copy (hidden under DMA).
    feat_out_ref[...] = feat_ref[...]
    mask_out_ref[...] = mask_ref[...]


def _pick_lane_width(total_elems: int, max_lane: int = 1024) -> int:
    """Largest multiple-of-128 lane width (<= max_lane) dividing total_elems."""
    if total_elems % 128 != 0:
        return 0
    lane = 128
    while lane < max_lane and total_elems % (lane * 2) == 0:
        lane *= 2
    return lane


def _pick_rows(rows_total: int, lane: int, itemsize: int, target_bytes: int) -> int:
    """Row-chunk size: ~target_bytes per array, multiple of 32, and an exact
    divisor of rows_total whenever one exists (no ragged final block)."""
    max_rows = max(1, target_bytes // (lane * itemsize))
    if max_rows >= rows_total:
        return rows_total  # single full-extent block (always a legal tiling)
    # Largest divisor of rows_total that is <= max_rows and a multiple of 32.
    start = min(max_rows, rows_total)
    for r in range(start, 31, -1):
        if r % 32 == 0 and rows_total % r == 0:
            return r
    # No suitable divisor: fall back to a multiple of 32 (Pallas masks the tail).
    r = max(32, max_rows - (max_rows % 32))
    return min(r, rows_total)


def simple_collator(feature: jax.Array, mask: jax.Array, *, use_pallas: bool = True):
    """Pallas implementation of SimpleCollator.forward.

    feature, mask: (B, S, T, C)  ->  ((B*S, T, C), (B*S, T, C))
    """
    assert feature.shape == mask.shape, "feature and mask must share a shape"
    B, S, T, C = feature.shape
    out_shape_3d = (B * S, T, C)
    total = B * S * T * C

    lane = _pick_lane_width(total)
    if not use_pallas or lane == 0:
        # Merging contiguous leading dims is a metadata-only reshape in XLA:
        # this is the fastest possible implementation (zero HBM traffic).
        return feature.reshape(out_shape_3d), mask.reshape(out_shape_3d)

    rows_total = total // lane
    itemsize = max(jnp.dtype(feature.dtype).itemsize, jnp.dtype(mask.dtype).itemsize)
    target_block_bytes = 4 << 20  # ~4 MiB/array/block: amortizes per-step overhead
    rows = _pick_rows(rows_total, lane, itemsize, target_block_bytes)

    grid = (pl.cdiv(rows_total, rows),)
    spec = pl.BlockSpec((rows, lane), lambda i: (i, 0))

    # Metadata-only reshapes at the boundary; the kernel sees lane-dense 2D views.
    feat2d = feature.reshape(rows_total, lane)
    mask2d = mask.reshape(rows_total, lane)

    feat_out2d, mask_out2d = pl.pallas_call(
        _copy_kernel,
        grid=grid,
        in_specs=[spec, spec],
        out_specs=[spec, spec],
        out_shape=(
            jax.ShapeDtypeStruct((rows_total, lane), feature.dtype),
            jax.ShapeDtypeStruct((rows_total, lane), mask.dtype),
        ),
        # Outputs donate the input HBM buffers -> effectively an in-place touch.
        input_output_aliases={0: 0, 1: 1},
        compiler_params=pltpu.CompilerParams(
            dimension_semantics=("parallel",),
            vmem_limit_bytes=48 << 20,  # 4 arrays x 2 bufs x <=4 MiB = <=32 MiB
        ),
    )(feat2d, mask2d)

    return feat_out2d.reshape(out_shape_3d), mask_out2d.reshape(out_shape_3d)


if __name__ == "__main__":
    key = jax.random.PRNGKey(0)
    k_feat, k_mask = jax.random.split(key)

    B, S, T, C = 2, 4, 8, 32
    feature = jax.random.normal(k_feat, (B, S, T, C), dtype=jnp.float32)
    mask = (jax.random.uniform(k_mask, (B, S, T, C)) > 0.5).astype(jnp.float32)

    collate = jax.jit(simple_collator)
    feat_out, mask_out = collate(feature, mask)
    jax.block_until_ready((feat_out, mask_out))

    # Correctness check against the plain-JAX reference (reshape).
    ref_feat = feature.reshape(B * S, T, C)
    ref_mask = mask.reshape(B * S, T, C)
    assert feat_out.shape == (B * S, T, C)
    assert mask_out.shape == (B * S, T, C)
    assert jnp.array_equal(feat_out, ref_feat)
    assert jnp.array_equal(mask_out, ref_mask)

    print("KERNEL_OK")
</pallas_src>

<mosaic_0001>
module attributes {stable_mosaic.version = 11 : i64} {
  func.func @_copy_kernel(%arg0: i32, %arg1: memref<2x1024xf32, #tpu.memory_space<vmem>>, %arg2: memref<2x1024xf32, #tpu.memory_space<vmem>>, %arg3: memref<2x1024xf32, #tpu.memory_space<vmem>>, %arg4: memref<2x1024xf32, #tpu.memory_space<vmem>>) attributes {dimension_semantics = [#tpu.dimension_semantics<parallel>], iteration_bounds = array<i64: 1>, scalar_prefetch = 0 : i64, scratch_operands = 0 : i64, tpu.core_type = #tpu.core_type<tc>, window_params = [{transform_indices = @transform_0, window_bounds = array<i64: 2, 1024>}, {transform_indices = @transform_1, window_bounds = array<i64: 2, 1024>}, {transform_indices = @transform_2, window_bounds = array<i64: 2, 1024>}, {transform_indices = @transform_3, window_bounds = array<i64: 2, 1024>}]} {
    %c0 = arith.constant 0 : index
    %c0_0 = arith.constant 0 : index
    %0 = vector.load %arg1[%c0, %c0_0] : memref<2x1024xf32, #tpu.memory_space<vmem>>, vector<2x1024xf32>
    %c0_1 = arith.constant 0 : index
    %c0_2 = arith.constant 0 : index
    %1 = vector.load %arg3[%c0_1, %c0_2] : memref<2x1024xf32, #tpu.memory_space<vmem>>, vector<2x1024xf32>
    tpu.vector_store %arg3[%c0_1, %c0_2], %0 {strides = array<i32>} : memref<2x1024xf32, #tpu.memory_space<vmem>>, vector<2x1024xf32>,
    %c0_3 = arith.constant 0 : index
    %c0_4 = arith.constant 0 : index
    %2 = vector.load %arg2[%c0_3, %c0_4] : memref<2x1024xf32, #tpu.memory_space<vmem>>, vector<2x1024xf32>
    %c0_5 = arith.constant 0 : index
    %c0_6 = arith.constant 0 : index
    %3 = vector.load %arg4[%c0_5, %c0_6] : memref<2x1024xf32, #tpu.memory_space<vmem>>, vector<2x1024xf32>
    tpu.vector_store %arg4[%c0_5, %c0_6], %2 {strides = array<i32>} : memref<2x1024xf32, #tpu.memory_space<vmem>>, vector<2x1024xf32>,
    return
  }
  func.func @transform_0(%arg0: i32) -> (i32, i32) {
    %c0_i32 = arith.constant 0 : i32
    %c0_i32_0 = arith.constant 0 : i32
    return %arg0, %c0_i32 : i32, i32
  }
  func.func @transform_1(%arg0: i32) -> (i32, i32) {
    %c0_i32 = arith.constant 0 : i32
    %c0_i32_0 = arith.constant 0 : i32
    return %arg0, %c0_i32 : i32, i32
  }
  func.func @transform_2(%arg0: i32) -> (i32, i32) {
    %c0_i32 = arith.constant 0 : i32
    %c0_i32_0 = arith.constant 0 : i32
    return %arg0, %c0_i32 : i32, i32
  }
  func.func @transform_3(%arg0: i32) -> (i32, i32) {
    %c0_i32 = arith.constant 0 : i32
    %c0_i32_0 = arith.constant 0 : i32
    return %arg0, %c0_i32 : i32, i32
  }
}

</mosaic_0001>

<bundles_post_ra>
// kernel: simple_collator.1
= control target key start
LH: loop header
LB: loop body
LE: loop exit
PB: predicated region body
PF: predicated region fallthrough
CT: control target
= control target key end

     0   :  { %s73_s0 = inlined_call_operand.vmem [shape: f32[2,1024], index: 0, kind: input, shape index: {}, may-alias: {0,2}]   ;;  %s74_s2 = inlined_call_operand.vmem [shape: f32[2,1024], index: 2, kind: output, shape index: {0}, may-alias: {0,2}]   ;;  %s75_s1 = inlined_call_operand.vmem [shape: f32[2,1024], index: 1, kind: input, shape index: {}, may-alias: {1,3}]   ;;  %s76_s3 = inlined_call_operand.vmem [shape: f32[2,1024], index: 3, kind: output, shape index: {1}, may-alias: {1,3}]  }
   0x1   :  { %v13_v0 = vld [vmem:[%s73_s0] sm:$0xff]  ;;  %v14_v1 = vld [vmem:[%s73_s0 + $0x8] sm:$0xff] }
   0x2   :  { %v17_v2 = vld [vmem:[%s75_s1] sm:$0xff]  ;;  %15 = vst [vmem:[%s74_s2] sm:$0xff] %v13_v0  ;;  %16 = vst [vmem:[%s74_s2 + $0x8] sm:$0xff] %v14_v1 }
   0x3   :  { %19 = vst [vmem:[%s76_s3] sm:$0xff] %v17_v2 }
   0xa   :  { %v18_v3 = vld [vmem:[%s75_s1 + $0x8] sm:$0xff] }
   0xb   :  { %20 = vst [vmem:[%s76_s3 + $0x8] sm:$0xff] %v18_v3 }

</bundles_post_ra>
